<compile_context>
chip_gen: v7x
topology: tpu7x:2x2x1
jax: 0.10.0
libtpu: 0.0.40
codegen_flags: <defaults>
</compile_context>

<pallas_src>
import jax
import jax.numpy as jnp
from jax.experimental import pallas as pl
from jax.experimental.pallas import tpu as pltpu


H1 = 128          # first hidden width (native 128)
H2 = 64           # second hidden width (PyTorch)
H2_PAD = 128      # hidden-64 padded to full lane width
OUT_PAD = 128     # action_dim padded to full lane width (lane-dense stores)
NEG_BIG = -1e30   # bias for padded action columns -> exp underflows to exactly 0


def policy_kernel(x_ref, w1_ref, b1_ref, w2_ref, b2_ref, w3_ref, b3_ref, o_ref):
    mm_dtype = w1_ref.dtype
    # Cast the f32 input tile to bf16 in-kernel (VPU has plenty of slack);
    # avoids a separate wrapper-side astype/HBM pass over x.
    x = x_ref[...].astype(mm_dtype)

    # Layer 1: Linear(state_dim -> 128) + ReLU (bf16 x bf16 -> f32 accumulate).
    h1 = jnp.dot(x, w1_ref[...], preferred_element_type=jnp.float32) + b1_ref[...]
    h1 = jnp.maximum(h1, 0.0)

    # Layer 2: Linear(128 -> 128)  (cols 64..127 of W2/b2 are zero padding).
    h2 = jnp.dot(h1.astype(mm_dtype), w2_ref[...],
                 preferred_element_type=jnp.float32) + b2_ref[...]
    h2 = jnp.maximum(h2, 0.0)

    # Layer 3: Linear(128 -> 128)  (rows 64.. of W3 zero; pad cols get -1e30 bias).
    logits = jnp.dot(h2.astype(mm_dtype), w3_ref[...],
                     preferred_element_type=jnp.float32) + b3_ref[...]

    # Numerically-stable softmax over the last dim (pad columns -> exactly 0).
    m = jnp.max(logits, axis=-1, keepdims=True)
    e = jnp.exp(logits - m)
    denom = jnp.sum(e, axis=-1, keepdims=True)
    # Exact normalization: rows sum to 1 up to f32 rounding.  (approx-reciprocal
    # broke the sum-to-1 property; the exact divide is free here.)
    o_ref[...] = (e / denom).astype(o_ref.dtype)


def _round_up(n, m):
    return ((n + m - 1) // m) * m


def prepare_params(params, matmul_dtype=jnp.bfloat16):
    """Pad hidden-64 / action dims to 128 and cast matmul operands for the MXU.

    Call ONCE per parameter update and cache the result: re-running these
    pad/cast ops every forward is pure wrapper overhead (the kernel already
    keeps the weights VMEM-resident via constant-index BlockSpecs).
    """
    action_dim = params["w3"].shape[1]
    assert params["w1"].shape[1] == H1 and params["w2"].shape == (H1, H2)
    assert action_dim <= OUT_PAD, "action_dim > 128 needs a second padding tier"

    w1 = params["w1"].astype(matmul_dtype)                                   # (S, 128)
    b1 = params["b1"].reshape(1, H1).astype(jnp.float32)                     # (1, 128)

    w2 = jnp.zeros((H1, H2_PAD), matmul_dtype).at[:, :H2].set(
        params["w2"].astype(matmul_dtype))                                   # (128, 128)
    b2 = jnp.zeros((1, H2_PAD), jnp.float32).at[:, :H2].set(
        params["b2"].reshape(1, H2).astype(jnp.float32))                     # (1, 128)

    w3 = jnp.zeros((H2_PAD, OUT_PAD), matmul_dtype).at[:H2, :action_dim].set(
        params["w3"].astype(matmul_dtype))                                   # (128, 128)
    b3 = jnp.full((1, OUT_PAD), NEG_BIG, jnp.float32).at[:, :action_dim].set(
        params["b3"].reshape(1, action_dim).astype(jnp.float32))             # (1, 128)

    return (w1, b1, w2, b2, w3, b3), action_dim


def policy_network_forward(x, prepared, action_dim, *, batch_tile=2048,
                           store_dtype=jnp.bfloat16):
    """x: (B, state_dim) or (state_dim,) float32. prepared: prepare_params output."""
    w1, b1, w2, b2, w3, b3 = prepared

    squeeze = (x.ndim == 1)
    if squeeze:
        x = x[None, :]
    B, state_dim = x.shape
    if B == 0:
        out = jnp.zeros((0, action_dim), jnp.float32)
        return out[0] if squeeze else out

    # Batch tile: multiple of 8 (sublane). Large default amortizes the ~0.35us
    # per-grid-step overhead; capped at ceil(B/2) so large batches always give
    # the "parallel" grid >= 2 steps (both v7x TensorCores get work).
    half_b = _round_up(max((B + 1) // 2, 1), 8)
    tb = min(batch_tile, half_b)
    b_pad = _round_up(B, tb)

    # x stays f32 here (kernel casts to bf16 on the VPU); pad only if needed.
    xp = x if b_pad == B else jnp.pad(x, ((0, b_pad - B), (0, 0)))

    grid = (b_pad // tb,)
    w_itemsize = jnp.dtype(w1.dtype).itemsize
    out_itemsize = jnp.dtype(store_dtype).itemsize

    cost = pl.CostEstimate(
        flops=2 * b_pad * (state_dim * H1 + H1 * H2_PAD + H2_PAD * OUT_PAD),
        transcendentals=b_pad * OUT_PAD,
        bytes_accessed=(b_pad * state_dim * 4
                        + (w1.size + w2.size + w3.size) * w_itemsize
                        + (b1.size + b2.size + b3.size) * 4
                        + b_pad * OUT_PAD * out_itemsize),
    )

    # Explicit VMEM budget sized from tb: keeps large tiles compiling on v5e's
    # 16 MiB scoped default, and never exceeds v7x's 64 MiB physical VMEM.
    weight_bytes = ((w1.size + w2.size + w3.size) * w_itemsize
                    + (b1.size + b2.size + b3.size) * 4)
    vmem_bytes = (2 * tb * state_dim * 4            # double-buffered x tile (f32)
                  + 2 * tb * OUT_PAD * out_itemsize  # double-buffered output tile
                  + 6 * tb * OUT_PAD * 4             # h1/h2/logits/e temps + slack
                  + 2 * weight_bytes)                # double-buffered (tiny) weights
    vmem_limit = int(min(64 << 20, max(vmem_bytes + (2 << 20), 16 << 20)))

    def full_block(a):
        # Same block index every grid step -> stays VMEM-resident (loaded once).
        return pl.BlockSpec(a.shape, lambda i: (0, 0))

    probs_pad = pl.pallas_call(
        policy_kernel,
        out_shape=jax.ShapeDtypeStruct((b_pad, OUT_PAD), store_dtype),
        grid=grid,
        in_specs=[
            pl.BlockSpec((tb, state_dim), lambda i: (i, 0)),   # x streamed per batch tile
            full_block(w1), full_block(b1),
            full_block(w2), full_block(b2),
            full_block(w3), full_block(b3),
        ],
        out_specs=pl.BlockSpec((tb, OUT_PAD), lambda i: (i, 0)),
        compiler_params=pltpu.CompilerParams(
            dimension_semantics=("parallel",),
            vmem_limit_bytes=vmem_limit),
        cost_estimate=cost,
    )(xp, w1, b1, w2, b2, w3, b3)

    # Tiny slice/cast on (B, action_dim) only; the big padded tile stays bf16.
    out = probs_pad[:B, :action_dim].astype(jnp.float32)
    return out[0] if squeeze else out


def init_params(key, state_dim, action_dim):
    """Deterministic init mimicking PyTorch Linear default (uniform +-1/sqrt(fan_in))."""
    ks = jax.random.split(key, 6)

    def lin(kw, kb, fan_in, fan_out):
        bound = 1.0 / jnp.sqrt(fan_in)
        w = jax.random.uniform(kw, (fan_in, fan_out), jnp.float32, -bound, bound)
        b = jax.random.uniform(kb, (1, fan_out), jnp.float32, -bound, bound)
        return w, b

    w1, b1 = lin(ks[0], ks[1], state_dim, H1)
    w2, b2 = lin(ks[2], ks[3], H1, H2)
    w3, b3 = lin(ks[4], ks[5], H2, action_dim)
    return {"w1": w1, "b1": b1, "w2": w2, "b2": b2, "w3": w3, "b3": b3}


if __name__ == "__main__":
    key = jax.random.PRNGKey(0)
    k_params, k_x = jax.random.split(key)

    B, state_dim, action_dim = 16, 32, 8
    params = init_params(k_params, state_dim, action_dim)
    x = jax.random.normal(k_x, (B, state_dim), jnp.float32)

    prepared, adim = prepare_params(params)   # hoisted: once per param update
    probs = policy_network_forward(x, prepared, adim)
    jax.block_until_ready(probs)

    # Pure-JAX reference using the same bf16-matmul / f32-accumulate recipe.
    mmd = jnp.bfloat16
    h1 = jnp.maximum(jnp.dot(x.astype(mmd), params["w1"].astype(mmd),
                             preferred_element_type=jnp.float32) + params["b1"], 0.0)
    h2 = jnp.maximum(jnp.dot(h1.astype(mmd), params["w2"].astype(mmd),
                             preferred_element_type=jnp.float32) + params["b2"], 0.0)
    logits = jnp.dot(h2.astype(mmd), params["w3"].astype(mmd),
                     preferred_element_type=jnp.float32) + params["b3"]
    ref = jax.nn.softmax(logits, axis=-1)

    assert probs.shape == (B, action_dim)
    # Tolerances account for the bf16 output store (~2^-9 relative rounding).
    assert jnp.allclose(jnp.sum(probs, axis=-1), 1.0, atol=5e-3)
    assert jnp.allclose(probs, ref, atol=5e-3)

    print("KERNEL_OK")
</pallas_src>

<mosaic_0001>
module attributes {stable_mosaic.version = 11 : i64} {
  func.func @policy_kernel(%arg0: i32, %arg1: memref<8x32xf32, #tpu.memory_space<vmem>>, %arg2: memref<32x128xbf16, #tpu.memory_space<vmem>>, %arg3: memref<1x128xf32, #tpu.memory_space<vmem>>, %arg4: memref<128x128xbf16, #tpu.memory_space<vmem>>, %arg5: memref<1x128xf32, #tpu.memory_space<vmem>>, %arg6: memref<128x128xbf16, #tpu.memory_space<vmem>>, %arg7: memref<1x128xf32, #tpu.memory_space<vmem>>, %arg8: memref<8x128xbf16, #tpu.memory_space<vmem>>) attributes {dimension_semantics = [#tpu.dimension_semantics<parallel>], iteration_bounds = array<i64: 2>, scalar_prefetch = 0 : i64, scratch_operands = 0 : i64, tpu.core_type = #tpu.core_type<tc>, window_params = [{transform_indices = @transform_0, window_bounds = array<i64: 8, 32>}, {pipeline_mode = #tpu.pipeline_mode<synchronous>, transform_indices = @transform_1, window_bounds = array<i64: 32, 128>}, {pipeline_mode = #tpu.pipeline_mode<synchronous>, transform_indices = @transform_2, window_bounds = array<i64: 1, 128>}, {pipeline_mode = #tpu.pipeline_mode<synchronous>, transform_indices = @transform_3, window_bounds = array<i64: 128, 128>}, {pipeline_mode = #tpu.pipeline_mode<synchronous>, transform_indices = @transform_4, window_bounds = array<i64: 1, 128>}, {pipeline_mode = #tpu.pipeline_mode<synchronous>, transform_indices = @transform_5, window_bounds = array<i64: 128, 128>}, {pipeline_mode = #tpu.pipeline_mode<synchronous>, transform_indices = @transform_6, window_bounds = array<i64: 1, 128>}, {transform_indices = @transform_7, window_bounds = array<i64: 8, 128>}]} {
    %c0 = arith.constant 0 : index
    %c0_0 = arith.constant 0 : index
    %0 = vector.load %arg1[%c0, %c0_0] : memref<8x32xf32, #tpu.memory_space<vmem>>, vector<8x32xf32>
    %1 = arith.truncf %0 : vector<8x32xf32> to vector<8x32xbf16>
    %c0_1 = arith.constant 0 : index
    %c0_2 = arith.constant 0 : index
    %2 = vector.load %arg2[%c0_1, %c0_2] : memref<32x128xbf16, #tpu.memory_space<vmem>>, vector<32x128xbf16>
    %cst = arith.constant dense<0.000000e+00> : vector<8x128xf32>
    %3 = tpu.matmul %1, %2, %cst {dimension_numbers = #tpu.dot_dimension_numbers<[1], [0], [0], [1], [0, 0, 1, 1], [], []>} : vector<8x32xbf16>, vector<32x128xbf16>, vector<8x128xf32> -> vector<8x128xf32>
    %c0_3 = arith.constant 0 : index
    %c0_4 = arith.constant 0 : index
    %4 = vector.load %arg3[%c0_3, %c0_4] : memref<1x128xf32, #tpu.memory_space<vmem>>, vector<1x128xf32>
    %5 = vector.broadcast %4 : vector<1x128xf32> to vector<8x128xf32>
    %6 = arith.addf %3, %5 : vector<8x128xf32>
    %cst_5 = arith.constant 0.000000e+00 : f32
    %7 = vector.broadcast %cst_5 : f32 to vector<8x128xf32>
    %8 = arith.maximumf %6, %7 : vector<8x128xf32>
    %9 = arith.truncf %8 : vector<8x128xf32> to vector<8x128xbf16>
    %c0_6 = arith.constant 0 : index
    %c0_7 = arith.constant 0 : index
    %10 = vector.load %arg4[%c0_6, %c0_7] : memref<128x128xbf16, #tpu.memory_space<vmem>>, vector<128x128xbf16>
    %cst_8 = arith.constant dense<0.000000e+00> : vector<8x128xf32>
    %11 = tpu.matmul %9, %10, %cst_8 {dimension_numbers = #tpu.dot_dimension_numbers<[1], [0], [0], [1], [0, 0, 1, 1], [], []>} : vector<8x128xbf16>, vector<128x128xbf16>, vector<8x128xf32> -> vector<8x128xf32>
    %c0_9 = arith.constant 0 : index
    %c0_10 = arith.constant 0 : index
    %12 = vector.load %arg5[%c0_9, %c0_10] : memref<1x128xf32, #tpu.memory_space<vmem>>, vector<1x128xf32>
    %13 = vector.broadcast %12 : vector<1x128xf32> to vector<8x128xf32>
    %14 = arith.addf %11, %13 : vector<8x128xf32>
    %cst_11 = arith.constant 0.000000e+00 : f32
    %15 = vector.broadcast %cst_11 : f32 to vector<8x128xf32>
    %16 = arith.maximumf %14, %15 : vector<8x128xf32>
    %17 = arith.truncf %16 : vector<8x128xf32> to vector<8x128xbf16>
    %c0_12 = arith.constant 0 : index
    %c0_13 = arith.constant 0 : index
    %18 = vector.load %arg6[%c0_12, %c0_13] : memref<128x128xbf16, #tpu.memory_space<vmem>>, vector<128x128xbf16>
    %cst_14 = arith.constant dense<0.000000e+00> : vector<8x128xf32>
    %19 = tpu.matmul %17, %18, %cst_14 {dimension_numbers = #tpu.dot_dimension_numbers<[1], [0], [0], [1], [0, 0, 1, 1], [], []>} : vector<8x128xbf16>, vector<128x128xbf16>, vector<8x128xf32> -> vector<8x128xf32>
    %c0_15 = arith.constant 0 : index
    %c0_16 = arith.constant 0 : index
    %20 = vector.load %arg7[%c0_15, %c0_16] : memref<1x128xf32, #tpu.memory_space<vmem>>, vector<1x128xf32>
    %21 = vector.broadcast %20 : vector<1x128xf32> to vector<8x128xf32>
    %22 = arith.addf %19, %21 : vector<8x128xf32>
    %cst_17 = arith.constant dense<0xFF800000> : vector<8xf32>
    %23 = vector.multi_reduction <maximumf>, %22, %cst_17 [1] : vector<8x128xf32> to vector<8xf32>
    %24 = vector.shape_cast %23 : vector<8xf32> to vector<8x1xf32>
    %25 = vector.broadcast %24 : vector<8x1xf32> to vector<8x128xf32>
    %26 = arith.subf %22, %25 : vector<8x128xf32>
    %27 = math.exp %26 : vector<8x128xf32>
    %cst_18 = arith.constant dense<0.000000e+00> : vector<8xf32>
    %28 = vector.multi_reduction <add>, %27, %cst_18 [1] : vector<8x128xf32> to vector<8xf32>
    %29 = vector.shape_cast %28 : vector<8xf32> to vector<8x1xf32>
    %30 = vector.broadcast %29 : vector<8x1xf32> to vector<8x128xf32>
    %31 = arith.divf %27, %30 : vector<8x128xf32>
    %32 = arith.truncf %31 : vector<8x128xf32> to vector<8x128xbf16>
    %c0_19 = arith.constant 0 : index
    %c0_20 = arith.constant 0 : index
    %33 = vector.load %arg8[%c0_19, %c0_20] : memref<8x128xbf16, #tpu.memory_space<vmem>>, vector<8x128xbf16>
    tpu.vector_store %arg8[%c0_19, %c0_20], %32 {strides = array<i32>} : memref<8x128xbf16, #tpu.memory_space<vmem>>, vector<8x128xbf16>,
    return
  }
  func.func @transform_0(%arg0: i32) -> (i32, i32) {
    %c0_i32 = arith.constant 0 : i32
    %c0_i32_0 = arith.constant 0 : i32
    return %arg0, %c0_i32 : i32, i32
  }
  func.func @transform_1(%arg0: i32) -> (i32, i32) {
    %c0_i32 = arith.constant 0 : i32
    %c0_i32_0 = arith.constant 0 : i32
    %c0_i32_1 = arith.constant 0 : i32
    return %c0_i32, %c0_i32_0 : i32, i32
  }
  func.func @transform_2(%arg0: i32) -> (i32, i32) {
    %c0_i32 = arith.constant 0 : i32
    %c0_i32_0 = arith.constant 0 : i32
    %c0_i32_1 = arith.constant 0 : i32
    return %c0_i32, %c0_i32_0 : i32, i32
  }
  func.func @transform_3(%arg0: i32) -> (i32, i32) {
    %c0_i32 = arith.constant 0 : i32
    %c0_i32_0 = arith.constant 0 : i32
    %c0_i32_1 = arith.constant 0 : i32
    return %c0_i32, %c0_i32_0 : i32, i32
  }
  func.func @transform_4(%arg0: i32) -> (i32, i32) {
    %c0_i32 = arith.constant 0 : i32
    %c0_i32_0 = arith.constant 0 : i32
    %c0_i32_1 = arith.constant 0 : i32
    return %c0_i32, %c0_i32_0 : i32, i32
  }
  func.func @transform_5(%arg0: i32) -> (i32, i32) {
    %c0_i32 = arith.constant 0 : i32
    %c0_i32_0 = arith.constant 0 : i32
    %c0_i32_1 = arith.constant 0 : i32
    return %c0_i32, %c0_i32_0 : i32, i32
  }
  func.func @transform_6(%arg0: i32) -> (i32, i32) {
    %c0_i32 = arith.constant 0 : i32
    %c0_i32_0 = arith.constant 0 : i32
    %c0_i32_1 = arith.constant 0 : i32
    return %c0_i32, %c0_i32_0 : i32, i32
  }
  func.func @transform_7(%arg0: i32) -> (i32, i32) {
    %c0_i32 = arith.constant 0 : i32
    %c0_i32_0 = arith.constant 0 : i32
    return %arg0, %c0_i32 : i32, i32
  }
}

</mosaic_0001>

<bundles_post_ra>
// kernel: tpu_custom_call.1
= control target key start
LH: loop header
LB: loop body
LE: loop exit
PB: predicated region body
PF: predicated region fallthrough
CT: control target
= control target key end

     0   :  { %12 = vsyncpa [#allocation3], 0  ;;  %s1506_s0 = inlined_call_operand.hbm [shape: f32[16,32], index: 0, kind: input, shape index: {}]   ;;  %s1507_s1 = inlined_call_operand.hbm [shape: bf16[32,128], index: 1, kind: input, shape index: {}]   ;;  %s1508_s2 = inlined_call_operand.vmem [shape: f32[1,128], index: 2, kind: input, shape index: {}]   ;;  %s1509_s3 = inlined_call_operand.hbm [shape: bf16[128,128], index: 3, kind: input, shape index: {}]   ;;  %s1510_s4 = inlined_call_operand.vmem [shape: f32[1,128], index: 4, kind: input, shape index: {}]   ;;  %s1511_s5 = inlined_call_operand.hbm [shape: bf16[128,128], index: 5, kind: input, shape index: {}]   ;;  %s1512_s6 = inlined_call_operand.vmem [shape: f32[1,128], index: 6, kind: input, shape index: {}]   ;;  %s1513_s7 = inlined_call_operand.hbm [shape: bf16[16,128], index: 7, kind: output, shape index: {}]  }
   0x1   :  { %14 = vsyncpa [#allocation3 + $0x1], 0 }
   0x2   :  { %15 = vsyncpa [#allocation6], 0 }
   0x3   :  { %16 = vsyncpa [#allocation9], 0 }
   0x4   :  { %17 = vsyncpa [#allocation4], 0 }
   0x5   :  { %19 = vsyncpa [#allocation4 + $0x1], 0  ;;  %s1209_s24 = smov 0   ;;  %s1211_s25 = smov 0  }
   0x6   :  { %s1213_s26 = smov 0   ;;  %s1215_s27 = smov 0  }
   0x7 LB: > { %s1230_s28 = sadd.s32 4294967295, %s1158_s27   ;;  %s758_s29 = sadd.s32 4294967294, %s1158_s27   ;;  %s1158_s27 = sphi %s1215_s27, %s1539_s27   ;;  %s1154_s26 = sphi %s1213_s26, %s1538_s26   ;;  %s1150_s25 = sphi %s1211_s25, %s1537_s25   ;;  %s1146_s24 = sphi %s1209_s24, %s1536_s24  }
   0x8   : > { %p45_p0 = scmp.ne.s32.totalorder %s1150_s25, %s1146_s24  ;;  %p1514_p1 = scmp.eq.s32.totalorder %s1230_s28, 0 }
   0x9   : > { %p201_p3 = scmp.eq.s32.totalorder %s758_s29, 1  ;;  %p759_p5 = scmp.ge.s32.totalorder %s1158_s27, 1 }
   0xa   : > { %p1239_p4 = por %p1514_p1, %p45_p0  ;;  %p208_p7 = scmp.lt.s32.totalorder %s1158_s27, 3 }
   0xb   : > { %p1244_p6 = por %p201_p3, %p45_p0  ;;  %s1160_s10 = smov [#allocation5]  }
   0xc   : > { %s1518_s30 = scalar_select %p1239_p4, 1, 0 }
   0xd   : > { %s1519_s8 = scalar_select %p1244_p6, 1, 0 }
   0xe   : > { %p1249_p8 = pnand %p759_p5, %p208_p7  ;;  %s220_s11 = sshll.u32 %s1160_s10, 4  ;;  %s1253_s11 = int_to_ptr.vmem [resolvable:$true] %s220_s11 }
   0xf   : > { %1520 = sst [smem:[#allocation15_spill]] %s1519_s8  ;;  %s1161_s13 = smov [#allocation7]  }
  0x10   : > { %s1521_s9 = scalar_select %p1249_p8, 1, 0 }
  0x11   : > { %p883_p9 = pneg %p1249_p8  ;;  %s236_s14 = sshll.u32 %s1161_s13, 4  ;;  %s1264_s14 = int_to_ptr.vmem [resolvable:$true] %s236_s14 }
  0x12   : > { %s1162_s15 = smov [#allocation8]   ;;  %s970_s19 = scalar_lea.hbm %s1507_s1, 256 }
  0x13   : > { %p1260_p11 = pnand %p883_p9, %p1514_p1  ;;  %s1266_s16 = sshll.u32 %s1162_s15, 4  ;;  %s253_s16 = int_to_ptr.vmem [resolvable:$true] %s1266_s16 }
  0x14   : > { %p971_p12 = scmp.ne.s32.totalorder %s1507_s1, %s970_s19  ;;  %p977_p5 = scmp.lt.u32.totalorder %s970_s19, %s1507_s1 }
  0x15   : > { %p1276_p13 = pneg %p1260_p11 }
  0x17   : > { %p973_p0 = pnand %p1276_p13, %p971_p12 }
  0x19   : > { %p974_p3 = pneg %p973_p0 }
  0x1b   : > { %p979_p7 = pnand %p977_p5, %p974_p3 }
  0x1d   : > { %982 = shalt.err (!%p979_p7)
}
  0x1e   : > { %s983_s10 = scalar_lea.vmem %s1253_s11, 256  ;;  %p991_p2 = scmp.lt.s32.totalorder %s1253_s11, %s1253_s11 }
  0x1f   : > { %p984_p9 = scmp.ne.s32.totalorder %s1253_s11, %s983_s10  ;;  %p992_p6 = scmp.lt.s32.totalorder %s983_s10, %s983_s10 }
  0x21   : > { %p986_p10 = pnand %p984_p9, %p1276_p13  ;;  %p993_p12 = por %p992_p6, %p991_p2 }
  0x23   : > { %p987_p1 = pneg %p986_p10 }
  0x25   : > { %p994_p0 = pnand %p993_p12, %p987_p1 }
  0x27   : > { %997 = shalt.err (!%p994_p0)
}
  0x28   : > { %s1163_s13 = smov 64   ;;  %s1164_s15 = smov 4  }
  0x29   : > { %886 = dma.hbm_to_vmem [thread:$0]  (!%p1260_p11), %s1507_s1, 256, %s1253_s11, [#allocation6], %s1163_s13, %s1163_s13, %s1164_s15  }
  0x2a   : > { %s998_s21 = scalar_lea.hbm %s1509_s3, 1024 }
  0x2b   : > { %p999_p1 = scmp.ne.s32.totalorder %s1509_s3, %s998_s21  ;;  %p1005_p10 = scmp.lt.u32.totalorder %s998_s21, %s1509_s3 }
  0x2d   : > { %p1001_p2 = pnand %p999_p1, %p1276_p13 }
  0x2f   : > { %p1002_p6 = pneg %p1001_p2 }
  0x31   : > { %p1007_p3 = pnand %p1005_p10, %p1002_p6 }
  0x33   : > { %1010 = shalt.err (!%p1007_p3)
}
  0x34   : > { %s1011_s11 = scalar_lea.vmem %s1264_s14, 1024  ;;  %p1019_p12 = scmp.lt.s32.totalorder %s1264_s14, %s1264_s14 }
  0x35   : > { %p1012_p5 = scmp.ne.s32.totalorder %s1264_s14, %s1011_s11  ;;  %p1020_p0 = scmp.lt.s32.totalorder %s1011_s11, %s1011_s11 }
  0x37   : > { %p1014_p7 = pnand %p1012_p5, %p1276_p13  ;;  %p1021_p1 = por %p1020_p0, %p1019_p12 }
  0x39   : > { %p1015_p9 = pneg %p1014_p7 }
  0x3b   : > { %p1022_p2 = pnand %p1021_p1, %p1015_p9 }
  0x3d   : > { %1025 = shalt.err (!%p1022_p2)
}
  0x3e   : > { %889 = dma.hbm_to_vmem [thread:$0]  (!%p1260_p11), %s1509_s3, 1024, %s1264_s14, [#allocation6], %s1163_s13, %s1163_s13, %s1164_s15  }
  0x3f   : > { %s1026_s20 = scalar_lea.hbm %s1511_s5, 1024 }
  0x40   : > { %p1027_p6 = scmp.ne.s32.totalorder %s1511_s5, %s1026_s20  ;;  %p1033_p5 = scmp.lt.u32.totalorder %s1026_s20, %s1511_s5 }
  0x42   : > { %p1029_p10 = pnand %p1027_p6, %p1276_p13 }
  0x44   : > { %p1030_p3 = pneg %p1029_p10 }
  0x46   : > { %p1035_p7 = pnand %p1033_p5, %p1030_p3 }
  0x48   : > { %1038 = shalt.err (!%p1035_p7)
}
  0x49   : > { %s1039_s11 = scalar_lea.vmem %s253_s16, 1024  ;;  %p1047_p1 = scmp.lt.s32.totalorder %s253_s16, %s253_s16 }
  0x4a   : > { %p1040_p9 = scmp.ne.s32.totalorder %s253_s16, %s1039_s11  ;;  %p1048_p2 = scmp.lt.s32.totalorder %s1039_s11, %s1039_s11 }
  0x4c   : > { %p1042_p12 = pnand %p1040_p9, %p1276_p13  ;;  %p1049_p4 = por %p1048_p2, %p1047_p1 }
  0x4e   : > { %p1043_p0 = pneg %p1042_p12 }
  0x50   : > { %p1050_p8 = pnand %p1049_p4, %p1043_p0 }
  0x52   : > { %1053 = shalt.err (!%p1050_p8)
}
  0x53   : > { %892 = dma.hbm_to_vmem [thread:$0]  (!%p1260_p11), %s1511_s5, 1024, %s253_s16, [#allocation9], %s1163_s13, %s1163_s13, %s1164_s15  }
  0x54   : > { %s1349_s22 = sadd.s32 1, %s1158_s27   ;;  %s32_s17 = sadd.s32 1, %s1154_s26 }
  0x55   : > { %s29_s12 = ssub.s32 %s1158_s27, %s1349_s22  ;;  %p39_p8 = scmp.ne.s32.totalorder %s1154_s26, %s1150_s25 }
  0x56   : > { %p30_p4 = scmp.eq.s32.totalorder %s29_s12, 0  ;;  %p40_p13 = scmp.eq.s32.totalorder %s1158_s27, 0 }
  0x57   : > { %p904_p6 = scmp.lt.s32.totalorder %s1158_s27, 2  ;;  %p1524_p3 = scmp.eq.s32.totalorder %s1230_s28, 1 }
  0x58   : > { %s1359_s18 = scalar_select %p30_p4, %s1154_s26, %s32_s17  }
  0x59   : > { %p41_p10 = por %p40_p13, %p39_p8  ;;  %p1363_p5 = por %p1524_p3, %p39_p8 }
  0x5a   : > { %s269_s20 = sand.u32 1, %s1154_s26   ;;  %s765_s21 = sshll.u32 %s1158_s27, 7 }
  0x5b   : > { %s764_s16 = sshll.u32 %s269_s20, 3  ;;  %s1372_s23 = scalar_lea.hbm %s1506_s0, %s765_s21 }
  0x5c   : > { %s273_s29 = scalar_lea.vmem [#allocation2], %s764_s16  ;;  %p1374_p11 = pnand %p904_p6, %p41_p10 }
  0x5d   : > { %s280_s10 = sshll.u32 %s273_s29, 4  ;;  %s270_s14 = scalar_lea.sflag [#allocation3], %s269_s20  ;;  %s1378_s10 = int_to_ptr.vmem [resolvable:$true] %s280_s10 }
  0x5e   : > { %s1054_s8 = scalar_lea.hbm %s1372_s23, 128  ;;  %p1056_p9 = pneg %p1374_p11 }
  0x5f   : > { %p1055_p7 = scmp.ne.s32.totalorder %s1372_s23, %s1054_s8  ;;  %s1059_s21 = scalar_lea.hbm %s1506_s0, 256 }
  0x60   : > { %p1060_p1 = scmp.lt.u32.totalorder %s1372_s23, %s1506_s0  ;;  %p1061_p2 = scmp.lt.u32.totalorder %s1059_s21, %s1054_s8 }
  0x61   : > { %p1057_p12 = pnand %p1056_p9, %p1055_p7  ;;  %p1063_p8 = scmp.lt.u32.totalorder %s1054_s8, %s1372_s23 }
  0x62   : > { %p1062_p4 = por %p1061_p2, %p1060_p1 }
  0x63   : > { %p1058_p0 = pneg %p1057_p12 }
  0x64   : > { %p1064_p13 = por %p1063_p8, %p1062_p4 }
  0x66   : > { %p1065_p6 = pnand %p1064_p13, %p1058_p0 }
  0x68   : > { %1068 = shalt.err (!%p1065_p6)
}
  0x69   : > { %s1069_s20 = scalar_lea.vmem %s1378_s10, 128  ;;  %s1165_s15 = smov [#allocation2]  }
  0x6a   : > { %p1070_p10 = scmp.ne.s32.totalorder %s1378_s10, %s1069_s20  ;;  %s1074_s29 = sshll.u32 %s1165_s15, 4  ;;  %s1075_s29 = int_to_ptr.vmem [resolvable:$false] %s1074_s29 }
  0x6b   : > { %s1076_s12 = scalar_lea.vmem %s1075_s29, 256  ;;  %p1077_p12 = scmp.lt.s32.totalorder %s1378_s10, %s1075_s29 }
  0x6c   : > { %p1072_p3 = pnand %p1070_p10, %p1056_p9  ;;  %p1078_p1 = scmp.lt.s32.totalorder %s1076_s12, %s1069_s20 }
  0x6e   : > { %p1073_p7 = pneg %p1072_p3  ;;  %p1079_p2 = por %p1078_p1, %p1077_p12 }
  0x70   : > { %p1080_p4 = pnand %p1079_p2, %p1073_p7 }
  0x72   : > { %1083 = shalt.err (!%p1080_p4)
}
  0x73   : > { %896 = dma.hbm_to_vmem [thread:$0]  (!%p1374_p11), %s1372_s23, 128, %s1378_s10, %s270_s14  }
  0x74   : > { %p1527_p0 = scmp.ne.s32.totalorder %s1521_s9, 0 }
  0x75   : > { %s1408_s8 = sand.u32 (!%p1527_p0), 1, %s1150_s25   ;;  %p1528_p9 = scmp.ne.s32.totalorder (!%p1527_p0), %s1518_s30, 0 }
  0x76   : > { %289 = sbr.rel (%p1527_p0) target bundleno = 1120 (0x460), region = 48  ;;  %s767_s17 = sshll.u32 (!%p1527_p0), %s1408_s8, 3 }
  0x77   : > { %s292_s21 = scalar_lea.sflag (!%p1527_p0), [#allocation3], %s1408_s8  ;;  %s295_s16 = scalar_lea.vmem (!%p1527_p0), [#allocation2], %s767_s17 }
  0x7d   : > { %1129 = dma.done.wait (%p1528_p9), %s292_s21, 128  }
  0x7e   : > { %1131 = vsyncadd (%p1528_p9), %s292_s21, 4294967168  ;;  %p1529_p8 = scmp.eq.s32.totalorder %s1230_s28, 0 }
  0x80   : > { %1133 = dma.done.wait (%p1529_p8), [#allocation6], 1280   ;;  %p1530_p11 = pmov %p1529_p8 }
  0x81   : > { %p1531_p13 = pmov %p1529_p8 }
  0x82   : > { %1135 = vsyncadd (%p1530_p11), [#allocation6], 4294966016 }
  0x83   : > { %1137 = dma.done.wait (%p1531_p13), [#allocation9], 1024   ;;  %p1532_p6 = pmov %p1529_p8 }
  0x84   : > { %v1166_v0 = vmov 0.0   ;;  %vm1167_vm0 = vmmov 0   ;;  %v948_v1 = vld [vmem:[#allocation5] sm:$0xff]   ;;  %v949_v2 = vld [vmem:[#allocation5 + $0x8] sm:$0xff]   ;;  %v339_v3 = vld [vmem:[%s295_s16] sm:$0xff]  ;;  %vm364_vm1 = vcmask 261120  }
  0x85   : > { %1139 = vsyncadd (%p1532_p6), [#allocation9], 4294966272  ;;  %819 = vmatprep.subr.bf16.mxu0 %v1166_v0  ;;  %823 = vmatprep.mubr.msk.bf16.mxu0 %vm1167_vm0, %v1166_v0  ;;  %v950_v4 = vld [vmem:[#allocation7] sm:$0xff]   ;;  %v340_v5 = vpack.c.bf16 %v339_v3, %v339_v3  ;;  %v951_v6 = vld [vmem:[#allocation7 + $0x8] sm:$0xff]   ;;  %s771_s13 = sshll.u32 %s1408_s8, 2  ;;  %s795_s20 = sshll.u32 %s1230_s28, 6 }
  0x86   : > { %827 = vmatprep.subr.bf16.mxu1 %v1166_v0  ;;  %843 = vmatprep.mubr.msk.bf16.mxu1 %vm1167_vm0, %v1166_v0  ;;  %v952_v7 = vld [vmem:[#allocation7 + $0x10] sm:$0xff]   ;;  %v953_v8 = vld [vmem:[#allocation7 + $0x18] sm:$0xff]   ;;  %v954_v9 = vld [vmem:[#allocation7 + $0x20] sm:$0xff]   ;;  %s337_s15 = scalar_lea.vmem [#allocation10], %s771_s13  ;;  %s1462_s21 = scalar_lea.hbm %s1513_s7, %s795_s20 }
  0x87   : > { %820 = vmatpush3.bf16.msra.mxu0 %v948_v1  ;;  %828 = vmatpush3.bf16.msra.mxu1 %v950_v4  ;;  %v955_v10 = vld [vmem:[#allocation7 + $0x28] sm:$0xff]   ;;  %v956_v11 = vld [vmem:[#allocation7 + $0x30] sm:$0xff]   ;;  %v957_v12 = vld [vmem:[#allocation7 + $0x38] sm:$0xff]   ;;  %s659_s29 = sshll.u32 %s337_s15, 4  ;;  %s646_s16 = scalar_lea.sflag [#allocation4], %s1408_s8  ;;  %s1464_s29 = int_to_ptr.vmem [resolvable:$true] %s659_s29 }
  0x88   : > { %821 = vmatprep.subr.bf16.mxu0 %v1166_v0  ;;  %829 = vmatprep.subr.bf16.mxu1 %v1166_v0  ;;  %v958_v13 = vld [vmem:[#allocation8] sm:$0xff]   ;;  %v959_v14 = vld [vmem:[#allocation8 + $0x8] sm:$0xff]   ;;  %v960_v15 = vld [vmem:[#allocation8 + $0x10] sm:$0xff]   ;;  %s1084_s30 = scalar_lea.vmem %s1464_s29, 64  ;;  %s1168_s28 = smov [#allocation10]  }
  0x89   : > { %v961_v16 = vld [vmem:[#allocation8 + $0x18] sm:$0xff]   ;;  %v962_v17 = vld [vmem:[#allocation8 + $0x20] sm:$0xff]   ;;  %v963_v18 = vld [vmem:[#allocation8 + $0x28] sm:$0xff]   ;;  %p1085_p10 = scmp.ne.s32.totalorder %s1464_s29, %s1084_s30  ;;  %s1088_s9 = sshll.u32 %s1168_s28, 4  ;;  %s1089_s9 = int_to_ptr.vmem [resolvable:$false] %s1088_s9 }
  0x8a   : > { %v772_v19 = vld [vmem:[%s1508_s2] ss:$0 sm:$0xff]  ;;  %v964_v27 = vld [vmem:[#allocation8 + $0x30] sm:$0xff]   ;;  %v965_v28 = vld [vmem:[#allocation8 + $0x38] sm:$0xff]   ;;  %s1090_s23 = scalar_lea.vmem %s1089_s9, 128  ;;  %p1091_p12 = scmp.lt.s32.totalorder %s1464_s29, %s1089_s9 }
  0x8b   : > { %822 = vmatpush3.bf16.msra.mxu0 %v949_v2  ;;  %830 = vmatpush3.bf16.msra.mxu1 %v951_v6  ;;  %v776_v29 = vld [vmem:[%s1510_s4] ss:$0 sm:$0xff]  ;;  %p1086_p3 = pnand %p1085_p10, %p1363_p5  ;;  %p1092_p1 = scmp.lt.s32.totalorder %s1090_s23, %s1084_s30 }
  0x8c   : > { %847 = vmatprep.subr.bf16.mxu0 %v1166_v0  ;;  %831 = vmatprep.subr.bf16.mxu1 %v1166_v0  ;;  %v785_v37 = vld [vmem:[%s1512_s6] ss:$0 sm:$0xff] }
  0x8d   : > { %p1087_p7 = pneg %p1086_p3  ;;  %p1093_p2 = por %p1092_p1, %p1091_p12 }
  0x8e   : > { %824 = vmatmul.mubr.msk.bf16.vlgmr.msra.gmra.mrb[0].mxu0 %vm364_vm1, %v340_v5 }
  0x8f   : > { %863 = vmatprep.mubr.msk.bf16.mxu0 %vm1167_vm0, %v1166_v0  ;;  %832 = vmatpush3.bf16.msra.mxu1 %v952_v7  ;;  %p1094_p4 = pnand %p1093_p2, %p1087_p7 }
  0x90   : > { %833 = vmatprep.subr.bf16.mxu1 %v1166_v0  ;;  %848 = vmatpush3.bf16.msra.mxu0 %v958_v13 }
  0x91   : > { %849 = vmatprep.subr.bf16.mxu0 %v1166_v0 }
  0x93   : > { %834 = vmatpush3.bf16.msra.mxu1 %v953_v8 }
  0x94   : > { %835 = vmatprep.subr.bf16.mxu1 %v1166_v0  ;;  %850 = vmatpush3.bf16.msra.mxu0 %v959_v14 }
  0x95   : > { %851 = vmatprep.subr.bf16.mxu0 %v1166_v0 }
  0x97   : > { %836 = vmatpush3.bf16.msra.mxu1 %v954_v9 }
  0x98   : > { %837 = vmatprep.subr.bf16.mxu1 %v1166_v0  ;;  %852 = vmatpush3.bf16.msra.mxu0 %v960_v15 }
  0x99   : > { %853 = vmatprep.subr.bf16.mxu0 %v1166_v0 }
  0x9b   : > { %838 = vmatpush3.bf16.msra.mxu1 %v955_v10 }
  0x9c   : > { %839 = vmatprep.subr.bf16.mxu1 %v1166_v0  ;;  %854 = vmatpush3.bf16.msra.mxu0 %v961_v16 }
  0x9d   : > { %855 = vmatprep.subr.bf16.mxu0 %v1166_v0 }
  0x9f   : > { %840 = vmatpush3.bf16.msra.mxu1 %v956_v11 }
  0xa0   : > { %841 = vmatprep.subr.bf16.mxu1 %v1166_v0  ;;  %856 = vmatpush3.bf16.msra.mxu0 %v962_v17 }
  0xa1   : > { %857 = vmatprep.subr.bf16.mxu0 %v1166_v0 }
  0xa3   : > { %842 = vmatpush3.bf16.msra.mxu1 %v957_v12 }
  0xa4   : > { %858 = vmatpush3.bf16.msra.mxu0 %v963_v18 }
  0xa5   : > { %859 = vmatprep.subr.bf16.mxu0 %v1166_v0 }
  0xa8   : > { %860 = vmatpush3.bf16.msra.mxu0 %v964_v27 }
  0xa9   : > { %861 = vmatprep.subr.bf16.mxu0 %v1166_v0 }
  0xac   : > { %862 = vmatpush3.bf16.msra.mxu0 %v965_v28 }
 0x161   : > { %v402_v20 = vpop.f32.mrb[0].mxu0 }
 0x162   : > { %v403_v21 = vadd.f32 %v772_v19, %v402_v20  ;;  %v825_v22 = vpop.f32.mrb[1].mxu0 }
 0x163   : > { %v405_v23 = vpop.f32.mrb[2].mxu0 }
 0x164   : > { %v408_v24 = vmax.f32 %v403_v21, 0.0  ;;  %v826_v25 = vpop.f32.mrb[3].mxu0 }
 0x166   : > { %v409_v26 = vpack.c.bf16 %v408_v24, %v408_v24 }
 0x168   : > { %844 = vmatmul.mubr.bf16.vlgmr.msra.gmra.mrb[0].mxu1 %v409_v26 }
 0x23b   : > { %v515_v30 = vpop.f32.mrb[0].mxu1 }
 0x23c   : > { %v516_v31 = vadd.f32 %v776_v29, %v515_v30  ;;  %v845_v32 = vpop.f32.mrb[1].mxu1 }
 0x23d   : > { %v518_v33 = vpop.f32.mrb[2].mxu1 }
 0x23e   : > { %v521_v34 = vmax.f32 %v516_v31, 0.0  ;;  %v846_v35 = vpop.f32.mrb[3].mxu1 }
 0x240   : > { %v522_v36 = vpack.c.bf16 %v521_v34, %v521_v34 }
 0x242   : > { %864 = vmatmul.mubr.bf16.vlgmr.msra.gmra.mrb[4].mxu0 %v522_v36 }
 0x315   : > { %v628_v38 = vpop.f32.mrb[4].mxu0 }
 0x316   : > { %v629_v39 = vadd.f32 %v785_v37, %v628_v38  ;;  %v865_v40 = vpop.f32.mrb[5].mxu0 }
 0x317   : > { %v631_v41 = vpop.f32.mrb[6].mxu0 }
 0x318   : > { %634 = vmax.xlane.f32.xlu0 %v629_v39  ;;  %v866_v42 = vpop.f32.mrb[7].mxu0 }
 0x3a5   : > { %v635_v43 = vpop.xlane.xlu0 %634 }
 0x3a6   : > { %v636_v44 = vsub.f32 %v629_v39, %v635_v43 }
 0x3a8   : > { %v637_v45 = vmul.f32 1.442695, %v636_v44 }
 0x3aa   : > { %966 = vpow2.f32 %v637_v45 }
 0x3b4   : > { %v967_v46 = vpop.eup %966 }
 0x3b5   : > { %639 = vadd.xlane.f32.xlu0 %v967_v46 }
 0x442   : > { %v640_v47 = vpop.xlane.xlu0 %639 }
 0x443   : > { %968 = vrcp.f32 %v640_v47 }
 0x44d   : > { %v969_v48 = vpop.eup %968 }
 0x44e   : > { %v642_v49 = vmul.f32 %v969_v48, %v967_v46 }
 0x450   : > { %v643_v50 = vpack.c.bf16 %v642_v49, %v642_v49 }
 0x452   : > { %644 = vst [vmem:[%s337_s15] sm:$0xf] %v643_v50 }
 0x453   : > { %1097 = shalt.err (!%p1094_p4)
}
 0x454   : > { %s1098_s8 = scalar_lea.hbm %s1462_s21, 64  ;;  %s1102_s14 = scalar_lea.hbm %s1513_s7, 128 }
 0x455   : > { %p1099_p0 = scmp.ne.s32.totalorder %s1462_s21, %s1098_s8  ;;  %p1103_p11 = scmp.lt.u32.totalorder %s1462_s21, %s1513_s7 }
 0x456   : > { %p1104_p13 = scmp.lt.u32.totalorder %s1102_s14, %s1098_s8  ;;  %p1106_p10 = scmp.lt.u32.totalorder %s1098_s8, %s1462_s21 }
 0x457   : > { %p1100_p9 = pnand %p1099_p0, %p1363_p5 }
 0x458   : > { %p1105_p6 = por %p1104_p13, %p1103_p11 }
 0x459   : > { %p1101_p8 = pneg %p1100_p9 }
 0x45a   : > { %p1107_p3 = por %p1106_p10, %p1105_p6 }
 0x45c   : > { %p1108_p7 = pnand %p1107_p3, %p1101_p8 }
 0x45e   : > { %1111 = shalt.err (!%p1108_p7)
}
 0x45f   : > { %881 = dma.vmem_to_hbm [thread:$0]  (%p1363_p5), %s1464_s29, 64, %s1462_s21, %s646_s16  }
 0x460 PF: > { %s1533_s15 = sld [smem:[#allocation15_spill]]  ;;  %s671_s12 = sand.u32 1, %s1146_s24  }
 0x461   : > { %p1535_p1 = scmp.ge.s32.totalorder %s1158_s27, 2  ;;  %s672_s17 = scalar_lea.sflag [#allocation4], %s671_s12 }
 0x466   : > { %p1534_p12 = scmp.ne.s32.totalorder %s1533_s15, 0 }
 0x468   : > { %p898_p2 = pnand %p1535_p1, %p1534_p12 }
 0x46a   : > { %1141 = dma.done.wait (!%p898_p2), %s672_s17, 64  }
 0x46b   : > { %1143 = vsyncadd (!%p898_p2), %s672_s17, 4294967232  ;;  %p22_p4 = scmp.ge.s32.totalorder %s1349_s22, 4   ;;  %s1536_s24 = smov %s1150_s25 }
 0x46c   : > { %s1537_s25 = smov %s1154_s26  ;;  %s1538_s26 = smov %s1359_s18 }
 0x46d   : > { %s1539_s27 = smov %s1349_s22  ;;  %24 = sbr.rel (!%p22_p4) target bundleno = 7 (0x7), region = 105 }
 0x474   :  { %677 = vsyncpa [#allocation3], 1 }
 0x475   :  { %679 = vsyncpa [#allocation3 + $0x1], 1 }
 0x476   :  { %680 = vsyncpa [#allocation6], 1 }
 0x477   :  { %681 = vsyncpa [#allocation9], 1 }
 0x478   :  { %682 = vsyncpa [#allocation4], 1 }
 0x479   :  { %684 = vsyncpa [#allocation4 + $0x1], 1 }

</bundles_post_ra>
